<compile_context>
chip_gen: v6e
topology: v6e:2x2x1
jax: 0.10.0
libtpu: 0.0.40
codegen_flags: <defaults>
</compile_context>

<pallas_src>
import jax
import jax.numpy as jnp
from jax.experimental import pallas as pl
from jax.experimental.pallas import tpu as pltpu

_DMA_RING = 8                      # max DMAs in flight (semaphore ring size)
_TARGET_CHUNK_BYTES = 4 << 20      # ~4 MiB per sub-copy when splitting
_MAX_SUBCOPIES_PER_INPUT = 32      # bound on unrolled descriptor count
_SMALL_BYTES_THRESHOLD = 1 << 20   # below this, XLA's native concat wins


def _make_concat_dma_kernel(n_in, sub_copies, ring):
    """Concatenate n_in NCHW HBM refs along channels into the HBM output via
    overlapping HBM->HBM DMAs, bounded to `ring` in flight.

    sub_copies: static list of (input_idx, c_start, c_len, out_c_start).
    """

    def kernel(*refs):
        in_refs = refs[:n_in]
        o_ref = refs[n_in]          # (N, total_C, H, W) HBM ref
        sems = refs[n_in + 1]       # SemaphoreType.DMA((ring,))
        started = []
        for i, (src, c0, clen, o0) in enumerate(sub_copies):
            if i >= ring:
                # Free this semaphore slot before reusing it.
                started[i - ring].wait()
            cp = pltpu.make_async_copy(
                in_refs[src].at[:, c0:c0 + clen],
                o_ref.at[:, o0:o0 + clen],
                sems.at[i % ring])
            cp.start()
            started.append(cp)
        # Drain the tail of the ring.
        for cp in started[max(0, len(started) - ring):]:
            cp.wait()

    return kernel


def model_forward(xs, *, force_pallas=False):
    """JAX/Pallas equivalent of Model.forward: concat(xs, axis=1)."""
    assert len(xs) > 0, "empty input list"
    n, _, h, w = xs[0].shape
    dtype = xs[0].dtype
    for x in xs:
        assert x.ndim == 4 and x.shape[0] == n and x.shape[2] == h \
            and x.shape[3] == w
        assert x.dtype == dtype
    total_c = sum(x.shape[1] for x in xs)
    # The PyTorch slice v1[:, 4194304:] is empty (so every cat([v, v3]) is a
    # no-op) iff total channels < 4194304; then forward == cat(xs, dim=1).
    assert total_c < 4194304

    # Zero-channel inputs contribute nothing.
    xs = [x for x in xs if x.shape[1] > 0]
    if not xs:
        return jnp.zeros((n, 0, h, w), dtype)
    channel_sizes = [x.shape[1] for x in xs]

    # Fast path 1: single input -> concat is the identity (no copy at all).
    if len(xs) == 1 and not force_pallas:
        return xs[0]

    itemsize = jnp.dtype(dtype).itemsize
    total_bytes = n * total_c * h * w * itemsize
    # Fast path 2: tiny inputs -- custom-call launch + DMA descriptors dwarf
    # the data movement; XLA's native concat is a single fused copy.
    if total_bytes < _SMALL_BYTES_THRESHOLD and not force_pallas:
        return jnp.concatenate(xs, axis=1)

    # Static sub-copy plan: split each input along the channel axis (a
    # non-minor, tile-aligned axis) into ~_TARGET_CHUNK_BYTES pieces so enough
    # DMAs are in flight to saturate HBM bandwidth on big inputs.
    per_chan_bytes = n * h * w * itemsize
    sub_copies = []
    out_off = 0
    for idx, c in enumerate(channel_sizes):
        in_bytes = c * per_chan_bytes
        n_chunks = max(1, min(_MAX_SUBCOPIES_PER_INPUT,
                              -(-in_bytes // _TARGET_CHUNK_BYTES)))
        n_chunks = min(n_chunks, c)
        base, rem = divmod(c, n_chunks)
        c0 = 0
        for j in range(n_chunks):
            clen = base + (1 if j < rem else 0)
            sub_copies.append((idx, c0, clen, out_off + c0))
            c0 += clen
        out_off += c
    ring = max(1, min(_DMA_RING, len(sub_copies)))

    kernel = _make_concat_dma_kernel(len(xs), sub_copies, ring)
    return pl.pallas_call(
        kernel,
        out_shape=jax.ShapeDtypeStruct((n, total_c, h, w), dtype),
        in_specs=[pl.BlockSpec(memory_space=pl.ANY) for _ in xs],
        out_specs=pl.BlockSpec(memory_space=pl.ANY),
        scratch_shapes=[pltpu.SemaphoreType.DMA((ring,))],
    )(*xs)


class Model:
    def __init__(self):
        # Parameter from the PyTorch module (shape [4,8,8]); unused in forward.
        self.t = jax.random.normal(jax.random.PRNGKey(42), (4, 8, 8),
                                   dtype=jnp.float32)

    def __call__(self, xs, *, force_pallas=False):
        return model_forward(xs, force_pallas=force_pallas)


if __name__ == "__main__":
    key = jax.random.PRNGKey(0)
    k0, k1 = jax.random.split(key)
    # Two NCHW tensors of [2, 8, 16, 16], concatenated along channels
    # -> [2, 16, 16, 16].
    x0 = jax.random.normal(k0, (2, 8, 16, 16), dtype=jnp.float32)
    x1 = jax.random.normal(k1, (2, 8, 16, 16), dtype=jnp.float32)
    xs = [x0, x1]

    model = Model()
    # Exercise the Pallas DMA path explicitly (these shapes are below the
    # small-input threshold, where the default path is jnp.concatenate).
    out_pallas = jax.block_until_ready(model(xs, force_pallas=True))
    # Default path (small-input fast path).
    out_fast = jax.block_until_ready(model(xs))

    ref = jnp.concatenate(xs, axis=1)
    assert out_pallas.shape == (2, 16, 16, 16), out_pallas.shape
    assert jnp.array_equal(out_pallas, ref), "Pallas concat mismatch"
    assert jnp.array_equal(out_fast, ref), "fast-path concat mismatch"
    print("KERNEL_OK")
</pallas_src>

<mosaic_0001>
module attributes {stable_mosaic.version = 11 : i64} {
  func.func @kernel(%arg0: memref<2x8x16x16xf32, #tpu.memory_space<any>>, %arg1: memref<2x8x16x16xf32, #tpu.memory_space<any>>, %arg2: memref<2x16x16x16xf32, #tpu.memory_space<any>>, %arg3: memref<2x!tpu.dma_semaphore, #tpu.memory_space<semaphore_mem>>) attributes {dimension_semantics = [], scalar_prefetch = 0 : i64, scratch_operands = 1 : i64, tpu.core_type = #tpu.core_type<tc>} {
    %c0_i32 = arith.constant 0 : i32
    %c0_i32_0 = arith.constant 0 : i32
    %c0_i32_1 = arith.constant 0 : i32
    %c0_i32_2 = arith.constant 0 : i32
    %c0_i32_3 = arith.constant 0 : i32
    %0 = tpu.memref_slice %arg0[%c0_i32_0, %c0_i32_1, %c0_i32_2, %c0_i32_3] : memref<2x8x16x16xf32, #tpu.memory_space<any>> -> memref<2x8x16x16xf32, #tpu.memory_space<any>>
    %c0_i32_4 = arith.constant 0 : i32
    %c0_i32_5 = arith.constant 0 : i32
    %c0_i32_6 = arith.constant 0 : i32
    %c0_i32_7 = arith.constant 0 : i32
    %1 = tpu.memref_slice %arg2[%c0_i32_4, %c0_i32_5, %c0_i32_6, %c0_i32_7] : memref<2x16x16x16xf32, #tpu.memory_space<any>> -> memref<2x8x16x16xf32, #tpu.memory_space<any>>
    %2 = tpu.memref_slice %arg3[%c0_i32] : memref<2x!tpu.dma_semaphore, #tpu.memory_space<semaphore_mem>> -> memref<1x!tpu.dma_semaphore, #tpu.memory_space<semaphore_mem>>
    %3 = tpu.memref_squeeze %2 : memref<1x!tpu.dma_semaphore, #tpu.memory_space<semaphore_mem>> -> memref<!tpu.dma_semaphore, #tpu.memory_space<semaphore_mem>>
    tpu.enqueue_dma source(%0 : memref<2x8x16x16xf32, #tpu.memory_space<any>>) target(%1 : memref<2x8x16x16xf32, #tpu.memory_space<any>>) target_semaphore(%3 : memref<!tpu.dma_semaphore, #tpu.memory_space<semaphore_mem>>)
    %c1_i32 = arith.constant 1 : i32
    %c0_i32_8 = arith.constant 0 : i32
    %c0_i32_9 = arith.constant 0 : i32
    %c0_i32_10 = arith.constant 0 : i32
    %c0_i32_11 = arith.constant 0 : i32
    %4 = tpu.memref_slice %arg1[%c0_i32_8, %c0_i32_9, %c0_i32_10, %c0_i32_11] : memref<2x8x16x16xf32, #tpu.memory_space<any>> -> memref<2x8x16x16xf32, #tpu.memory_space<any>>
    %c0_i32_12 = arith.constant 0 : i32
    %c8_i32 = arith.constant 8 : i32
    %c0_i32_13 = arith.constant 0 : i32
    %c0_i32_14 = arith.constant 0 : i32
    %5 = tpu.memref_slice %arg2[%c0_i32_12, %c8_i32, %c0_i32_13, %c0_i32_14] : memref<2x16x16x16xf32, #tpu.memory_space<any>> -> memref<2x8x16x16xf32, #tpu.memory_space<any>>
    %6 = tpu.memref_slice %arg3[%c1_i32] : memref<2x!tpu.dma_semaphore, #tpu.memory_space<semaphore_mem>> -> memref<1x!tpu.dma_semaphore, #tpu.memory_space<semaphore_mem>>
    %7 = tpu.memref_squeeze %6 : memref<1x!tpu.dma_semaphore, #tpu.memory_space<semaphore_mem>> -> memref<!tpu.dma_semaphore, #tpu.memory_space<semaphore_mem>>
    tpu.enqueue_dma source(%4 : memref<2x8x16x16xf32, #tpu.memory_space<any>>) target(%5 : memref<2x8x16x16xf32, #tpu.memory_space<any>>) target_semaphore(%7 : memref<!tpu.dma_semaphore, #tpu.memory_space<semaphore_mem>>)
    %c0_i32_15 = arith.constant 0 : i32
    %c0_i32_16 = arith.constant 0 : i32
    %c0_i32_17 = arith.constant 0 : i32
    %c0_i32_18 = arith.constant 0 : i32
    %c0_i32_19 = arith.constant 0 : i32
    %8 = tpu.memref_slice %arg0[%c0_i32_16, %c0_i32_17, %c0_i32_18, %c0_i32_19] : memref<2x8x16x16xf32, #tpu.memory_space<any>> -> memref<2x8x16x16xf32, #tpu.memory_space<any>>
    %c0_i32_20 = arith.constant 0 : i32
    %c0_i32_21 = arith.constant 0 : i32
    %c0_i32_22 = arith.constant 0 : i32
    %c0_i32_23 = arith.constant 0 : i32
    %9 = tpu.memref_slice %arg2[%c0_i32_20, %c0_i32_21, %c0_i32_22, %c0_i32_23] : memref<2x16x16x16xf32, #tpu.memory_space<any>> -> memref<2x8x16x16xf32, #tpu.memory_space<any>>
    %10 = tpu.memref_slice %arg3[%c0_i32_15] : memref<2x!tpu.dma_semaphore, #tpu.memory_space<semaphore_mem>> -> memref<1x!tpu.dma_semaphore, #tpu.memory_space<semaphore_mem>>
    %11 = tpu.memref_squeeze %10 : memref<1x!tpu.dma_semaphore, #tpu.memory_space<semaphore_mem>> -> memref<!tpu.dma_semaphore, #tpu.memory_space<semaphore_mem>>
    tpu.wait_dma2 semaphore(%11 : memref<!tpu.dma_semaphore, #tpu.memory_space<semaphore_mem>>) src(%8 : memref<2x8x16x16xf32, #tpu.memory_space<any>>) dst(%9 : memref<2x8x16x16xf32, #tpu.memory_space<any>>)
    %c1_i32_24 = arith.constant 1 : i32
    %c0_i32_25 = arith.constant 0 : i32
    %c0_i32_26 = arith.constant 0 : i32
    %c0_i32_27 = arith.constant 0 : i32
    %c0_i32_28 = arith.constant 0 : i32
    %12 = tpu.memref_slice %arg1[%c0_i32_25, %c0_i32_26, %c0_i32_27, %c0_i32_28] : memref<2x8x16x16xf32, #tpu.memory_space<any>> -> memref<2x8x16x16xf32, #tpu.memory_space<any>>
    %c0_i32_29 = arith.constant 0 : i32
    %c8_i32_30 = arith.constant 8 : i32
    %c0_i32_31 = arith.constant 0 : i32
    %c0_i32_32 = arith.constant 0 : i32
    %13 = tpu.memref_slice %arg2[%c0_i32_29, %c8_i32_30, %c0_i32_31, %c0_i32_32] : memref<2x16x16x16xf32, #tpu.memory_space<any>> -> memref<2x8x16x16xf32, #tpu.memory_space<any>>
    %14 = tpu.memref_slice %arg3[%c1_i32_24] : memref<2x!tpu.dma_semaphore, #tpu.memory_space<semaphore_mem>> -> memref<1x!tpu.dma_semaphore, #tpu.memory_space<semaphore_mem>>
    %15 = tpu.memref_squeeze %14 : memref<1x!tpu.dma_semaphore, #tpu.memory_space<semaphore_mem>> -> memref<!tpu.dma_semaphore, #tpu.memory_space<semaphore_mem>>
    tpu.wait_dma2 semaphore(%15 : memref<!tpu.dma_semaphore, #tpu.memory_space<semaphore_mem>>) src(%12 : memref<2x8x16x16xf32, #tpu.memory_space<any>>) dst(%13 : memref<2x8x16x16xf32, #tpu.memory_space<any>>)
    return
  }
}

</mosaic_0001>

<bundles_post_ra>
// kernel: tpu_custom_call.1
= control target key start
LH: loop header
LB: loop body
LE: loop exit
PB: predicated region body
PF: predicated region fallthrough
CT: control target
= control target key end

     0   :  { %s68_s9 = smov 2048   ;;  %s69_s10 = smov 4096   ;;  %s102_s0 = inlined_call_operand.hbm [shape: f32[2,8,16,16], index: 0, kind: input, shape index: {}]   ;;  %s103_s1 = inlined_call_operand.hbm [shape: f32[2,8,16,16], index: 1, kind: input, shape index: {}]   ;;  %s104_s2 = inlined_call_operand.hbm [shape: f32[2,16,16,16], index: 2, kind: output, shape index: {}]  }
   0x1   :  { %13 = sst [smem:[#allocation4]] %s68_s9  ;;  %s70_s11 = smov 128  }
   0x2   :  { %15 = sst [smem:[#allocation4 + $0x1]] %s69_s10  ;;  %s20_s14 = scalar_lea.hbm %s104_s2, 2048 }
   0x3   :  { %17 = sst [smem:[#allocation4 + $0x2]] %s70_s11  ;;  %s71_s15 = smov [#allocation2]  }
   0x4   :  { %s72_s16 = smov 131072   ;;  %s73_s17 = smov 0  }
   0x5   :  { %19 = dma.general %s102_s0, 4096, %s104_s2, %s71_s15, %s72_s16, [#allocation4], %s73_s17, 0  }
   0x6   :  { %28 = sst [smem:[#allocation6]] %s68_s9  ;;  %s74_s22 = smov [#allocation2 + $0x1]  }
   0x7   :  { %30 = sst [smem:[#allocation6 + $0x1]] %s69_s10 }
   0x8   :  { %32 = sst [smem:[#allocation6 + $0x2]] %s70_s11 }
   0x9   :  { %34 = dma.general %s103_s1, 4096, %s20_s14, %s74_s22, %s72_s16, [#allocation6], %s73_s17, 0  }
   0xa   :  { %64 = dma.done.wait [#allocation2], 4096 }
   0xb   :  { %65 = vsyncadd [#allocation2], 4294963200 }
   0xc   :  { %66 = dma.done.wait [#allocation2 + $0x1], 4096 }
   0xd   :  { %67 = vsyncadd [#allocation2 + $0x1], 4294963200 }
   0xe   :  { %42 = vsyncmov [#allocation2] }
  0x11   :  { %s43_s25 = vpop.sfrf %42 }
  0x12   :  { %p55_p0 = scmp.ne.s32.totalorder %s43_s25, 0 }
  0x14   :  { %47 = shalt.err (%p55_p0)  }
  0x15   :  { %49 = vsyncmov [#allocation2 + $0x1] }
  0x18   :  { %s50_s26 = vpop.sfrf %49 }
  0x19   :  { %p56_p1 = scmp.ne.s32.totalorder %s50_s26, 0 }
  0x1b   :  { %54 = shalt.err (%p56_p1)  }

</bundles_post_ra>
